<compile_context>
chip_gen: v6e
topology: v6e:2x2x1
jax: 0.10.0
libtpu: 0.0.40
codegen_flags: <defaults>
</compile_context>

<pallas_src>
import math

import jax
import jax.numpy as jnp
from jax.experimental import pallas as pl
from jax.experimental.pallas import tpu as pltpu

# ---- Config (synthetic, small) ----
BATCH = 2
SEQ = 8          # decoder sequence length
ENC_SEQ = 8      # encoder sequence length
D_MODEL = 32
HEADS = 4
D_K = D_MODEL // HEADS
MLP = 64
EPS = 1e-5       # nn.LayerNorm default eps


def decoder_layer_kernel(x_ref, enc_ref, bias_ref, ln_ref, ff_ref, o_ref):
    B, S, D = x_ref.shape
    HB = HEADS * B

    x = x_ref[...]            # (B, S, D)
    enc = enc_ref[...]        # (B, Se, D)
    ln = ln_ref[...]          # (6+H, D): g1,b1,g2,b2,g3,b3, head-mask rows
    bias = bias_ref[...]      # (H*B, S, S) additive mask bias (0 / -1e9)

    # Per-head channel mask, stacked head-major to (H*B, 1, D): slice h*B+b keeps
    # exactly channels [h*D_K, (h+1)*D_K) (matches view(B,-1,H,d_k).transpose(1,2)).
    # Built from static rows packed into ln_pack — leading-dim concat only.
    head_mask = jnp.concatenate(
        [jnp.broadcast_to(ln[6 + h:7 + h][None], (B, 1, D)) for h in range(HEADS)],
        axis=0)

    def rep(t):
        # (B, S, D) -> (H*B, S, D): replicate over heads along the leading dim.
        return jnp.concatenate([t] * HEADS, axis=0)

    def layernorm(v, g, b):
        mu = jnp.mean(v, axis=-1, keepdims=True)
        var = jnp.mean((v - mu) ** 2, axis=-1, keepdims=True)
        return (v - mu) * jax.lax.rsqrt(var + EPS) * g + b

    scale = jnp.float32(1.0 / math.sqrt(D_K))

    def mha(q, kv, add_bias=None):
        # q: (B, Sq, D); kv: (B, Sk, D) with k == v (module passes the same tensor).
        # K/V are channel-masked per head, so the full-D contraction equals the
        # per-head d_k contraction exactly (masked lanes contribute exact zeros),
        # and the PV result for stacked slice h*B+b is nonzero only in head h's
        # channel lanes — summing over heads assembles the concat with 3 adds.
        q_rep = rep(q * scale)                    # (H*B, Sq, D)
        kv_msk = rep(kv) * head_mask              # (H*B, Sk, D)
        sc = jnp.einsum('bqd,bkd->bqk', q_rep, kv_msk,
                        preferred_element_type=jnp.float32)       # (H*B, Sq, Sk)
        if add_bias is not None:
            sc = sc + add_bias                    # one batched add for all heads
        p = jax.nn.softmax(sc, axis=-1)           # one softmax for all heads
        o = jnp.einsum('bqk,bkd->bqd', p, kv_msk,
                       preferred_element_type=jnp.float32)        # (H*B, Sq, D)
        out = o[0:B]
        for h in range(1, HEADS):
            out = out + o[h * B:(h + 1) * B]      # head re-assembly: 3 vreg adds
        return out                                # (B, Sq, D)

    # --- sublayer 1: masked self-attention ---
    x1 = layernorm(x, ln[0:1], ln[1:2])
    x = x + mha(x1, x1, bias)          # dropout1 == identity (eval)

    # --- sublayer 2: cross-attention with encoder output (no mask) ---
    x1 = layernorm(x, ln[2:3], ln[3:4])
    x = x + mha(x1, enc)               # dropout2 == identity (eval)

    # --- sublayer 3: feed-forward on the (B*S, D) fold (plain 2-D matmuls) ---
    xf = x.reshape(B * S, D)
    x1 = layernorm(xf, ln[4:5], ln[5:6])
    w1 = ff_ref[0:D, 0:MLP]                     # (D, MLP)
    w2t = ff_ref[0:D, MLP:2 * MLP]              # (D, MLP) == W2^T
    brow = ff_ref[D:D + 1, :]                   # (1, 2*MLP): [bb1 | bb2 | 0]
    h = jnp.maximum(
        jnp.dot(x1, w1, preferred_element_type=jnp.float32) + brow[:, 0:MLP], 0.0)
    y = jax.lax.dot_general(h, w2t, (((1,), (1,)), ((), ())),
                            preferred_element_type=jnp.float32)   # h @ W2
    o_ref[...] = (xf + y + brow[:, MLP:MLP + D]).astype(o_ref.dtype)  # dropout3 == id


def pack_params(params):
    """Build the two packed parameter slabs ONCE at init time (not per call)."""
    g1, b1, g2, b2, g3, b3, w1, bb1, w2, bb2 = params
    # Static per-head channel-mask rows (head h keeps channels [h*D_K,(h+1)*D_K)).
    head_rows = (jnp.arange(D_MODEL)[None, :] // D_K
                 == jnp.arange(HEADS)[:, None]).astype(jnp.float32)        # (H, D)
    ln_pack = jnp.concatenate([g1, b1, g2, b2, g3, b3, head_rows], axis=0)  # (6+H, D)
    bias_row = jnp.concatenate(
        [bb1, bb2, jnp.zeros((1, 2 * MLP - MLP - D_MODEL), jnp.float32)], axis=1)
    ff_pack = jnp.concatenate(
        [jnp.concatenate([w1, w2.T], axis=1), bias_row], axis=0)  # (D+1, 2*MLP)=(33,128)
    return ln_pack, ff_pack


def decoder_layer(x, enc, mask, ln_pack, ff_pack):
    B, S, D = x.shape
    Sk = mask.shape[-1]
    # Additive mask bias (== masked_fill(mask==0, -1e9) up to the score offset,
    # identical after softmax), replicated over heads in the head-major stacking
    # order h*B+b used inside the kernel.  Per-call because mask is a forward arg.
    bias = jnp.where(mask == 0.0, jnp.float32(-1e9), jnp.float32(0.0))
    bias_rep = jnp.broadcast_to(bias[None], (HEADS, B, S, Sk)).reshape(HEADS * B, S, Sk)

    vmem = pl.BlockSpec(memory_space=pltpu.MemorySpace.VMEM)
    out = pl.pallas_call(
        decoder_layer_kernel,
        out_shape=jax.ShapeDtypeStruct((B * S, D), x.dtype),
        in_specs=[vmem] * 5,            # x, enc, bias, ln_pack, ff_pack
        out_specs=vmem,
    )(x, enc, bias_rep, ln_pack, ff_pack)
    return out.reshape(B, S, D)


# ---------- pure-JAX reference for verification ----------
def reference(x, enc, mask, params):
    g1, b1, g2, b2, g3, b3, w1, bb1, w2, bb2 = params

    def ln(v, g, bb):
        mu = jnp.mean(v, -1, keepdims=True)
        var = jnp.mean((v - mu) ** 2, -1, keepdims=True)
        return (v - mu) * jax.lax.rsqrt(var + EPS) * g + bb

    def mha(q, kv, m=None):
        B, S, D = q.shape
        Sk = kv.shape[1]
        qh = q.reshape(B, S, HEADS, D_K).transpose(0, 2, 1, 3)
        kh = kv.reshape(B, Sk, HEADS, D_K).transpose(0, 2, 1, 3)
        vh = kh
        sc = jnp.einsum('bhsd,bhtd->bhst', qh, kh) / math.sqrt(D_K)
        if m is not None:
            sc = jnp.where(m[:, None] == 0, -1e9, sc)
        p = jax.nn.softmax(sc, axis=-1)
        o = jnp.einsum('bhst,bhtd->bhsd', p, vh)
        return o.transpose(0, 2, 1, 3).reshape(B, S, D)

    x1 = ln(x, g1, b1)
    x = x + mha(x1, x1, mask)
    x1 = ln(x, g2, b2)
    x = x + mha(x1, enc)
    x1 = ln(x, g3, b3)
    h = jnp.maximum(x1 @ w1 + bb1, 0.0)
    x = x + (h @ w2 + bb2)
    return x


if __name__ == "__main__":
    key = jax.random.PRNGKey(0)
    ks = jax.random.split(key, 8)

    x = jax.random.normal(ks[0], (BATCH, SEQ, D_MODEL), jnp.float32)
    enc = jax.random.normal(ks[1], (BATCH, ENC_SEQ, D_MODEL), jnp.float32)
    # causal mask, broadcast over heads
    mask = jnp.tril(jnp.ones((SEQ, SEQ), jnp.float32))
    mask = jnp.broadcast_to(mask, (BATCH, SEQ, SEQ))

    params = (
        1.0 + 0.05 * jax.random.normal(ks[2], (1, D_MODEL), jnp.float32),  # g1
        0.05 * jax.random.normal(ks[3], (1, D_MODEL), jnp.float32),        # b1
        1.0 + 0.05 * jax.random.normal(ks[4], (1, D_MODEL), jnp.float32),  # g2
        0.05 * jax.random.normal(ks[5], (1, D_MODEL), jnp.float32),        # b2
        1.0 + 0.05 * jax.random.normal(ks[6], (1, D_MODEL), jnp.float32),  # g3
        0.05 * jax.random.normal(ks[7], (1, D_MODEL), jnp.float32),        # b3
        0.1 * jax.random.normal(jax.random.PRNGKey(1), (D_MODEL, MLP), jnp.float32),  # W1
        0.1 * jax.random.normal(jax.random.PRNGKey(2), (1, MLP), jnp.float32),        # b1
        0.1 * jax.random.normal(jax.random.PRNGKey(3), (MLP, D_MODEL), jnp.float32),  # W2
        0.1 * jax.random.normal(jax.random.PRNGKey(4), (1, D_MODEL), jnp.float32),    # b2
    )

    # Packed once at parameter-init time (NOT in the per-call wrapper).
    ln_pack, ff_pack = pack_params(params)

    out = decoder_layer(x, enc, mask, ln_pack, ff_pack)
    out = jax.block_until_ready(out)

    ref = reference(x, enc, mask, params)
    assert out.shape == (BATCH, SEQ, D_MODEL)
    assert jnp.allclose(out, ref, atol=1e-4, rtol=1e-4), (
        f"max err {jnp.max(jnp.abs(out - ref))}")

    print("KERNEL_OK")
</pallas_src>

<mosaic_0001>
module attributes {stable_mosaic.version = 11 : i64} {
  func.func @decoder_layer_kernel(%arg0: memref<2x8x32xf32, #tpu.memory_space<vmem>>, %arg1: memref<2x8x32xf32, #tpu.memory_space<vmem>>, %arg2: memref<8x8x8xf32, #tpu.memory_space<vmem>>, %arg3: memref<10x32xf32, #tpu.memory_space<vmem>>, %arg4: memref<33x128xf32, #tpu.memory_space<vmem>>, %arg5: memref<16x32xf32, #tpu.memory_space<vmem>>) attributes {dimension_semantics = [], scalar_prefetch = 0 : i64, scratch_operands = 0 : i64, tpu.core_type = #tpu.core_type<tc>} {
    %c0 = arith.constant 0 : index
    %c0_0 = arith.constant 0 : index
    %c0_1 = arith.constant 0 : index
    %0 = vector.load %arg0[%c0, %c0_0, %c0_1] : memref<2x8x32xf32, #tpu.memory_space<vmem>>, vector<2x8x32xf32>
    %c0_2 = arith.constant 0 : index
    %c0_3 = arith.constant 0 : index
    %c0_4 = arith.constant 0 : index
    %1 = vector.load %arg1[%c0_2, %c0_3, %c0_4] : memref<2x8x32xf32, #tpu.memory_space<vmem>>, vector<2x8x32xf32>
    %c0_5 = arith.constant 0 : index
    %c0_6 = arith.constant 0 : index
    %2 = vector.load %arg3[%c0_5, %c0_6] : memref<10x32xf32, #tpu.memory_space<vmem>>, vector<10x32xf32>
    %c0_7 = arith.constant 0 : index
    %c0_8 = arith.constant 0 : index
    %c0_9 = arith.constant 0 : index
    %3 = vector.load %arg2[%c0_7, %c0_8, %c0_9] : memref<8x8x8xf32, #tpu.memory_space<vmem>>, vector<8x8x8xf32>
    %4 = vector.extract_strided_slice %2 {offsets = [6, 0], sizes = [1, 32], strides = [1, 1]} : vector<10x32xf32> to vector<1x32xf32>
    %5 = vector.shape_cast %4 : vector<1x32xf32> to vector<1x1x32xf32>
    %6 = vector.shape_cast %5 : vector<1x1x32xf32> to vector<1x1x32xf32>
    %7 = vector.broadcast %6 : vector<1x1x32xf32> to vector<2x1x32xf32>
    %8 = vector.extract_strided_slice %2 {offsets = [7, 0], sizes = [1, 32], strides = [1, 1]} : vector<10x32xf32> to vector<1x32xf32>
    %9 = vector.shape_cast %8 : vector<1x32xf32> to vector<1x1x32xf32>
    %10 = vector.shape_cast %9 : vector<1x1x32xf32> to vector<1x1x32xf32>
    %11 = vector.broadcast %10 : vector<1x1x32xf32> to vector<2x1x32xf32>
    %12 = vector.extract_strided_slice %2 {offsets = [8, 0], sizes = [1, 32], strides = [1, 1]} : vector<10x32xf32> to vector<1x32xf32>
    %13 = vector.shape_cast %12 : vector<1x32xf32> to vector<1x1x32xf32>
    %14 = vector.shape_cast %13 : vector<1x1x32xf32> to vector<1x1x32xf32>
    %15 = vector.broadcast %14 : vector<1x1x32xf32> to vector<2x1x32xf32>
    %16 = vector.extract_strided_slice %2 {offsets = [9, 0], sizes = [1, 32], strides = [1, 1]} : vector<10x32xf32> to vector<1x32xf32>
    %17 = vector.shape_cast %16 : vector<1x32xf32> to vector<1x1x32xf32>
    %18 = vector.shape_cast %17 : vector<1x1x32xf32> to vector<1x1x32xf32>
    %19 = vector.broadcast %18 : vector<1x1x32xf32> to vector<2x1x32xf32>
    %20 = tpu.concatenate %7, %11, %15, %19 in 0 : vector<2x1x32xf32>, vector<2x1x32xf32>, vector<2x1x32xf32>, vector<2x1x32xf32> -> vector<8x1x32xf32>
    %21 = vector.extract_strided_slice %2 {offsets = [0, 0], sizes = [1, 32], strides = [1, 1]} : vector<10x32xf32> to vector<1x32xf32>
    %22 = vector.extract_strided_slice %2 {offsets = [1, 0], sizes = [1, 32], strides = [1, 1]} : vector<10x32xf32> to vector<1x32xf32>
    %cst = arith.constant dense<0.000000e+00> : vector<2x8xf32>
    %23 = vector.multi_reduction <add>, %0, %cst [2] : vector<2x8x32xf32> to vector<2x8xf32>
    %24 = vector.shape_cast %23 : vector<2x8xf32> to vector<2x8x1xf32>
    %cst_10 = arith.constant 3.200000e+01 : f32
    %25 = vector.broadcast %cst_10 : f32 to vector<2x8x1xf32>
    %26 = arith.divf %24, %25 : vector<2x8x1xf32>
    %27 = vector.broadcast %26 : vector<2x8x1xf32> to vector<2x8x32xf32>
    %28 = arith.subf %0, %27 : vector<2x8x32xf32>
    %29 = arith.mulf %28, %28 : vector<2x8x32xf32>
    %cst_11 = arith.constant dense<0.000000e+00> : vector<2x8xf32>
    %30 = vector.multi_reduction <add>, %29, %cst_11 [2] : vector<2x8x32xf32> to vector<2x8xf32>
    %31 = vector.shape_cast %30 : vector<2x8xf32> to vector<2x8x1xf32>
    %cst_12 = arith.constant 3.200000e+01 : f32
    %32 = vector.broadcast %cst_12 : f32 to vector<2x8x1xf32>
    %33 = arith.divf %31, %32 : vector<2x8x1xf32>
    %34 = vector.broadcast %26 : vector<2x8x1xf32> to vector<2x8x32xf32>
    %35 = arith.subf %0, %34 : vector<2x8x32xf32>
    %cst_13 = arith.constant 9.99999974E-6 : f32
    %36 = vector.broadcast %cst_13 : f32 to vector<2x8x1xf32>
    %37 = arith.addf %33, %36 : vector<2x8x1xf32>
    %38 = math.rsqrt %37 : vector<2x8x1xf32>
    %39 = vector.broadcast %38 : vector<2x8x1xf32> to vector<2x8x32xf32>
    %40 = arith.mulf %35, %39 : vector<2x8x32xf32>
    %41 = vector.shape_cast %21 : vector<1x32xf32> to vector<1x1x32xf32>
    %42 = vector.broadcast %41 : vector<1x1x32xf32> to vector<2x8x32xf32>
    %43 = arith.mulf %40, %42 : vector<2x8x32xf32>
    %44 = vector.shape_cast %22 : vector<1x32xf32> to vector<1x1x32xf32>
    %45 = vector.broadcast %44 : vector<1x1x32xf32> to vector<2x8x32xf32>
    %46 = arith.addf %43, %45 : vector<2x8x32xf32>
    %cst_14 = arith.constant 0.353553385 : f32
    %47 = vector.broadcast %cst_14 : f32 to vector<2x8x32xf32>
    %48 = arith.mulf %46, %47 : vector<2x8x32xf32>
    %49 = tpu.concatenate %48, %48, %48, %48 in 0 : vector<2x8x32xf32>, vector<2x8x32xf32>, vector<2x8x32xf32>, vector<2x8x32xf32> -> vector<8x8x32xf32>
    %50 = tpu.concatenate %46, %46, %46, %46 in 0 : vector<2x8x32xf32>, vector<2x8x32xf32>, vector<2x8x32xf32>, vector<2x8x32xf32> -> vector<8x8x32xf32>
    %51 = vector.broadcast %20 : vector<8x1x32xf32> to vector<8x8x32xf32>
    %52 = arith.mulf %50, %51 : vector<8x8x32xf32>
    "tpu.trace_start"() <{level = 10 : i32, message = "bqd,bkd->bqk"}> : () -> ()
    %cst_15 = arith.constant dense<0.000000e+00> : vector<8x8x8xf32>
    %53 = tpu.matmul %49, %52, %cst_15 {dimension_numbers = #tpu.dot_dimension_numbers<[2], [2], [1], [1], [0, 0, 0, 1, 1, 1], [0], [0]>} : vector<8x8x32xf32>, vector<8x8x32xf32>, vector<8x8x8xf32> -> vector<8x8x8xf32>
    "tpu.trace_stop"() : () -> ()
    %54 = arith.addf %53, %3 : vector<8x8x8xf32>
    %cst_16 = arith.constant dense<0xFF800000> : vector<8x8xf32>
    %55 = vector.multi_reduction <maximumf>, %54, %cst_16 [2] : vector<8x8x8xf32> to vector<8x8xf32>
    %cst_17 = arith.constant 0xFF800000 : f32
    %56 = vector.broadcast %cst_17 : f32 to vector<8x8xf32>
    %57 = arith.maximumf %56, %55 : vector<8x8xf32>
    %58 = vector.shape_cast %57 : vector<8x8xf32> to vector<8x8x1xf32>
    %59 = vector.broadcast %58 : vector<8x8x1xf32> to vector<8x8x8xf32>
    %60 = arith.subf %54, %59 : vector<8x8x8xf32>
    %61 = math.exp %60 : vector<8x8x8xf32>
    %cst_18 = arith.constant dense<0.000000e+00> : vector<8x8xf32>
    %62 = vector.multi_reduction <add>, %61, %cst_18 [2] : vector<8x8x8xf32> to vector<8x8xf32>
    %63 = vector.shape_cast %62 : vector<8x8xf32> to vector<8x8x1xf32>
    %64 = vector.broadcast %63 : vector<8x8x1xf32> to vector<8x8x8xf32>
    %65 = arith.divf %61, %64 : vector<8x8x8xf32>
    "tpu.trace_start"() <{level = 10 : i32, message = "bqk,bkd->bqd"}> : () -> ()
    %cst_19 = arith.constant dense<0.000000e+00> : vector<8x8x32xf32>
    %66 = tpu.matmul %65, %52, %cst_19 {dimension_numbers = #tpu.dot_dimension_numbers<[2], [1], [1], [2], [0, 0, 0, 1, 1, 2], [0], [0]>} : vector<8x8x8xf32>, vector<8x8x32xf32>, vector<8x8x32xf32> -> vector<8x8x32xf32>
    "tpu.trace_stop"() : () -> ()
    %67 = vector.extract_strided_slice %66 {offsets = [0, 0, 0], sizes = [2, 8, 32], strides = [1, 1, 1]} : vector<8x8x32xf32> to vector<2x8x32xf32>
    %68 = vector.extract_strided_slice %66 {offsets = [2, 0, 0], sizes = [2, 8, 32], strides = [1, 1, 1]} : vector<8x8x32xf32> to vector<2x8x32xf32>
    %69 = arith.addf %67, %68 : vector<2x8x32xf32>
    %70 = vector.extract_strided_slice %66 {offsets = [4, 0, 0], sizes = [2, 8, 32], strides = [1, 1, 1]} : vector<8x8x32xf32> to vector<2x8x32xf32>
    %71 = arith.addf %69, %70 : vector<2x8x32xf32>
    %72 = vector.extract_strided_slice %66 {offsets = [6, 0, 0], sizes = [2, 8, 32], strides = [1, 1, 1]} : vector<8x8x32xf32> to vector<2x8x32xf32>
    %73 = arith.addf %71, %72 : vector<2x8x32xf32>
    %74 = arith.addf %0, %73 : vector<2x8x32xf32>
    %75 = vector.extract_strided_slice %2 {offsets = [2, 0], sizes = [1, 32], strides = [1, 1]} : vector<10x32xf32> to vector<1x32xf32>
    %76 = vector.extract_strided_slice %2 {offsets = [3, 0], sizes = [1, 32], strides = [1, 1]} : vector<10x32xf32> to vector<1x32xf32>
    %cst_20 = arith.constant dense<0.000000e+00> : vector<2x8xf32>
    %77 = vector.multi_reduction <add>, %74, %cst_20 [2] : vector<2x8x32xf32> to vector<2x8xf32>
    %78 = vector.shape_cast %77 : vector<2x8xf32> to vector<2x8x1xf32>
    %cst_21 = arith.constant 3.200000e+01 : f32
    %79 = vector.broadcast %cst_21 : f32 to vector<2x8x1xf32>
    %80 = arith.divf %78, %79 : vector<2x8x1xf32>
    %81 = vector.broadcast %80 : vector<2x8x1xf32> to vector<2x8x32xf32>
    %82 = arith.subf %74, %81 : vector<2x8x32xf32>
    %83 = arith.mulf %82, %82 : vector<2x8x32xf32>
    %cst_22 = arith.constant dense<0.000000e+00> : vector<2x8xf32>
    %84 = vector.multi_reduction <add>, %83, %cst_22 [2] : vector<2x8x32xf32> to vector<2x8xf32>
    %85 = vector.shape_cast %84 : vector<2x8xf32> to vector<2x8x1xf32>
    %cst_23 = arith.constant 3.200000e+01 : f32
    %86 = vector.broadcast %cst_23 : f32 to vector<2x8x1xf32>
    %87 = arith.divf %85, %86 : vector<2x8x1xf32>
    %88 = vector.broadcast %80 : vector<2x8x1xf32> to vector<2x8x32xf32>
    %89 = arith.subf %74, %88 : vector<2x8x32xf32>
    %cst_24 = arith.constant 9.99999974E-6 : f32
    %90 = vector.broadcast %cst_24 : f32 to vector<2x8x1xf32>
    %91 = arith.addf %87, %90 : vector<2x8x1xf32>
    %92 = math.rsqrt %91 : vector<2x8x1xf32>
    %93 = vector.broadcast %92 : vector<2x8x1xf32> to vector<2x8x32xf32>
    %94 = arith.mulf %89, %93 : vector<2x8x32xf32>
    %95 = vector.shape_cast %75 : vector<1x32xf32> to vector<1x1x32xf32>
    %96 = vector.broadcast %95 : vector<1x1x32xf32> to vector<2x8x32xf32>
    %97 = arith.mulf %94, %96 : vector<2x8x32xf32>
    %98 = vector.shape_cast %76 : vector<1x32xf32> to vector<1x1x32xf32>
    %99 = vector.broadcast %98 : vector<1x1x32xf32> to vector<2x8x32xf32>
    %100 = arith.addf %97, %99 : vector<2x8x32xf32>
    %cst_25 = arith.constant 0.353553385 : f32
    %101 = vector.broadcast %cst_25 : f32 to vector<2x8x32xf32>
    %102 = arith.mulf %100, %101 : vector<2x8x32xf32>
    %103 = tpu.concatenate %102, %102, %102, %102 in 0 : vector<2x8x32xf32>, vector<2x8x32xf32>, vector<2x8x32xf32>, vector<2x8x32xf32> -> vector<8x8x32xf32>
    %104 = tpu.concatenate %1, %1, %1, %1 in 0 : vector<2x8x32xf32>, vector<2x8x32xf32>, vector<2x8x32xf32>, vector<2x8x32xf32> -> vector<8x8x32xf32>
    %105 = vector.broadcast %20 : vector<8x1x32xf32> to vector<8x8x32xf32>
    %106 = arith.mulf %104, %105 : vector<8x8x32xf32>
    "tpu.trace_start"() <{level = 10 : i32, message = "bqd,bkd->bqk"}> : () -> ()
    %cst_26 = arith.constant dense<0.000000e+00> : vector<8x8x8xf32>
    %107 = tpu.matmul %103, %106, %cst_26 {dimension_numbers = #tpu.dot_dimension_numbers<[2], [2], [1], [1], [0, 0, 0, 1, 1, 1], [0], [0]>} : vector<8x8x32xf32>, vector<8x8x32xf32>, vector<8x8x8xf32> -> vector<8x8x8xf32>
    "tpu.trace_stop"() : () -> ()
    %cst_27 = arith.constant dense<0xFF800000> : vector<8x8xf32>
    %108 = vector.multi_reduction <maximumf>, %107, %cst_27 [2] : vector<8x8x8xf32> to vector<8x8xf32>
    %cst_28 = arith.constant 0xFF800000 : f32
    %109 = vector.broadcast %cst_28 : f32 to vector<8x8xf32>
    %110 = arith.maximumf %109, %108 : vector<8x8xf32>
    %111 = vector.shape_cast %110 : vector<8x8xf32> to vector<8x8x1xf32>
    %112 = vector.broadcast %111 : vector<8x8x1xf32> to vector<8x8x8xf32>
    %113 = arith.subf %107, %112 : vector<8x8x8xf32>
    %114 = math.exp %113 : vector<8x8x8xf32>
    %cst_29 = arith.constant dense<0.000000e+00> : vector<8x8xf32>
    %115 = vector.multi_reduction <add>, %114, %cst_29 [2] : vector<8x8x8xf32> to vector<8x8xf32>
    %116 = vector.shape_cast %115 : vector<8x8xf32> to vector<8x8x1xf32>
    %117 = vector.broadcast %116 : vector<8x8x1xf32> to vector<8x8x8xf32>
    %118 = arith.divf %114, %117 : vector<8x8x8xf32>
    "tpu.trace_start"() <{level = 10 : i32, message = "bqk,bkd->bqd"}> : () -> ()
    %cst_30 = arith.constant dense<0.000000e+00> : vector<8x8x32xf32>
    %119 = tpu.matmul %118, %106, %cst_30 {dimension_numbers = #tpu.dot_dimension_numbers<[2], [1], [1], [2], [0, 0, 0, 1, 1, 2], [0], [0]>} : vector<8x8x8xf32>, vector<8x8x32xf32>, vector<8x8x32xf32> -> vector<8x8x32xf32>
    "tpu.trace_stop"() : () -> ()
    %120 = vector.extract_strided_slice %119 {offsets = [0, 0, 0], sizes = [2, 8, 32], strides = [1, 1, 1]} : vector<8x8x32xf32> to vector<2x8x32xf32>
    %121 = vector.extract_strided_slice %119 {offsets = [2, 0, 0], sizes = [2, 8, 32], strides = [1, 1, 1]} : vector<8x8x32xf32> to vector<2x8x32xf32>
    %122 = arith.addf %120, %121 : vector<2x8x32xf32>
    %123 = vector.extract_strided_slice %119 {offsets = [4, 0, 0], sizes = [2, 8, 32], strides = [1, 1, 1]} : vector<8x8x32xf32> to vector<2x8x32xf32>
    %124 = arith.addf %122, %123 : vector<2x8x32xf32>
    %125 = vector.extract_strided_slice %119 {offsets = [6, 0, 0], sizes = [2, 8, 32], strides = [1, 1, 1]} : vector<8x8x32xf32> to vector<2x8x32xf32>
    %126 = arith.addf %124, %125 : vector<2x8x32xf32>
    %127 = arith.addf %74, %126 : vector<2x8x32xf32>
    %128 = vector.shape_cast %127 : vector<2x8x32xf32> to vector<16x32xf32>
    %129 = vector.extract_strided_slice %2 {offsets = [4, 0], sizes = [1, 32], strides = [1, 1]} : vector<10x32xf32> to vector<1x32xf32>
    %130 = vector.extract_strided_slice %2 {offsets = [5, 0], sizes = [1, 32], strides = [1, 1]} : vector<10x32xf32> to vector<1x32xf32>
    %cst_31 = arith.constant dense<0.000000e+00> : vector<16xf32>
    %131 = vector.multi_reduction <add>, %128, %cst_31 [1] : vector<16x32xf32> to vector<16xf32>
    %132 = vector.shape_cast %131 : vector<16xf32> to vector<16x1xf32>
    %cst_32 = arith.constant 3.200000e+01 : f32
    %133 = vector.broadcast %cst_32 : f32 to vector<16x1xf32>
    %134 = arith.divf %132, %133 : vector<16x1xf32>
    %135 = vector.broadcast %134 : vector<16x1xf32> to vector<16x32xf32>
    %136 = arith.subf %128, %135 : vector<16x32xf32>
    %137 = arith.mulf %136, %136 : vector<16x32xf32>
    %cst_33 = arith.constant dense<0.000000e+00> : vector<16xf32>
    %138 = vector.multi_reduction <add>, %137, %cst_33 [1] : vector<16x32xf32> to vector<16xf32>
    %139 = vector.shape_cast %138 : vector<16xf32> to vector<16x1xf32>
    %cst_34 = arith.constant 3.200000e+01 : f32
    %140 = vector.broadcast %cst_34 : f32 to vector<16x1xf32>
    %141 = arith.divf %139, %140 : vector<16x1xf32>
    %142 = vector.broadcast %134 : vector<16x1xf32> to vector<16x32xf32>
    %143 = arith.subf %128, %142 : vector<16x32xf32>
    %cst_35 = arith.constant 9.99999974E-6 : f32
    %144 = vector.broadcast %cst_35 : f32 to vector<16x1xf32>
    %145 = arith.addf %141, %144 : vector<16x1xf32>
    %146 = math.rsqrt %145 : vector<16x1xf32>
    %147 = vector.broadcast %146 : vector<16x1xf32> to vector<16x32xf32>
    %148 = arith.mulf %143, %147 : vector<16x32xf32>
    %149 = vector.broadcast %129 : vector<1x32xf32> to vector<16x32xf32>
    %150 = arith.mulf %148, %149 : vector<16x32xf32>
    %151 = vector.broadcast %130 : vector<1x32xf32> to vector<16x32xf32>
    %152 = arith.addf %150, %151 : vector<16x32xf32>
    %c0_36 = arith.constant 0 : index
    %c0_37 = arith.constant 0 : index
    %153 = vector.load %arg4[%c0_36, %c0_37] : memref<33x128xf32, #tpu.memory_space<vmem>>, vector<32x64xf32>
    %c0_38 = arith.constant 0 : index
    %c64 = arith.constant 64 : index
    %154 = vector.load %arg4[%c0_38, %c64] : memref<33x128xf32, #tpu.memory_space<vmem>>, vector<32x64xf32>
    %c32 = arith.constant 32 : index
    %c0_39 = arith.constant 0 : index
    %155 = vector.load %arg4[%c32, %c0_39] : memref<33x128xf32, #tpu.memory_space<vmem>>, vector<1x128xf32>
    %cst_40 = arith.constant dense<0.000000e+00> : vector<16x64xf32>
    %156 = tpu.matmul %152, %153, %cst_40 {dimension_numbers = #tpu.dot_dimension_numbers<[1], [0], [0], [1], [0, 0, 1, 1], [], []>} : vector<16x32xf32>, vector<32x64xf32>, vector<16x64xf32> -> vector<16x64xf32>
    %157 = vector.extract_strided_slice %155 {offsets = [0, 0], sizes = [1, 64], strides = [1, 1]} : vector<1x128xf32> to vector<1x64xf32>
    %158 = vector.broadcast %157 : vector<1x64xf32> to vector<16x64xf32>
    %159 = arith.addf %156, %158 : vector<16x64xf32>
    %cst_41 = arith.constant 0.000000e+00 : f32
    %160 = vector.broadcast %cst_41 : f32 to vector<16x64xf32>
    %161 = arith.maximumf %159, %160 : vector<16x64xf32>
    %cst_42 = arith.constant dense<0.000000e+00> : vector<16x32xf32>
    %162 = tpu.matmul %161, %154, %cst_42 {dimension_numbers = #tpu.dot_dimension_numbers<[1], [1], [0], [0], [0, 0, 1, 0], [], []>} : vector<16x64xf32>, vector<32x64xf32>, vector<16x32xf32> -> vector<16x32xf32>
    %163 = arith.addf %128, %162 : vector<16x32xf32>
    %164 = vector.extract_strided_slice %155 {offsets = [0, 64], sizes = [1, 32], strides = [1, 1]} : vector<1x128xf32> to vector<1x32xf32>
    %165 = vector.broadcast %164 : vector<1x32xf32> to vector<16x32xf32>
    %166 = arith.addf %163, %165 : vector<16x32xf32>
    %c0_43 = arith.constant 0 : index
    %c0_44 = arith.constant 0 : index
    %167 = vector.load %arg5[%c0_43, %c0_44] : memref<16x32xf32, #tpu.memory_space<vmem>>, vector<16x32xf32>
    tpu.vector_store %arg5[%c0_43, %c0_44], %166 {strides = array<i32>} : memref<16x32xf32, #tpu.memory_space<vmem>>, vector<16x32xf32>,
    return
  }
}

</mosaic_0001>

<bundles_post_ra>
// kernel: tpu_custom_call.1
= control target key start
LH: loop header
LB: loop body
LE: loop exit
PB: predicated region body
PF: predicated region fallthrough
CT: control target
= control target key end

     0   :  { %10 = vsyncpa [#allocation3], 0  ;;  %s3961_s0 = inlined_call_operand.hbm [shape: f32[2,8,32], index: 0, kind: input, shape index: {}]   ;;  %s3962_s1 = inlined_call_operand.hbm [shape: f32[2,8,32], index: 1, kind: input, shape index: {}]   ;;  %s3963_s2 = inlined_call_operand.hbm [shape: f32[8,8,8], index: 2, kind: input, shape index: {}]   ;;  %s3964_s3 = inlined_call_operand.hbm [shape: f32[10,32], index: 3, kind: input, shape index: {}]   ;;  %s3965_s4 = inlined_call_operand.hbm [shape: f32[33,128], index: 4, kind: input, shape index: {}]   ;;  %s3966_s5 = inlined_call_operand.hbm [shape: f32[16,32], index: 5, kind: output, shape index: {}]  }
   0x1   :  { %11 = vsyncpa [#allocation6], 0 }
   0x2   :  { %12 = vsyncpa [#allocation9], 0 }
   0x3   :  { %13 = vsyncpa [#allocation4], 0  ;;  %s3558_s18 = smov [#allocation5]   ;;  %s3559_s20 = smov [#allocation8]  }
   0x4   :  { %s31_s19 = sshll.u32 %s3558_s18, 4  ;;  %s55_s21 = sshll.u32 %s3559_s20, 4  ;;  %s32_s19 = int_to_ptr.vmem [resolvable:$true] %s31_s19  ;;  %s56_s21 = int_to_ptr.vmem [resolvable:$true] %s55_s21 }
   0x5   :  { %s3438_s22 = scalar_lea.vmem %s32_s19, 256  ;;  %p3443_p1 = scmp.lt.s32.totalorder %s32_s19, %s32_s19 }
   0x6   :  { %p3439_p0 = scmp.ne.s32.totalorder %s32_s19, %s3438_s22  ;;  %p3444_p2 = scmp.lt.s32.totalorder %s3438_s22, %s3438_s22 }
   0x8   :  { %p3445_p3 = por %p3444_p2, %p3443_p1 }
   0xa   :  { %p3446_p4 = pnand %p3445_p3, %p3439_p0 }
   0xc   :  { %3449 = shalt.err (!%p3446_p4)
}
   0xd   :  { %s3560_s23 = smov 128   ;;  %s3561_s24 = smov 8  }
   0xe   :  { %37 = dma.hbm_to_vmem [thread:$0]  %s3962_s1, 256, %s32_s19, [#allocation6], %s3560_s23, %s3560_s23, %s3561_s24  }
   0xf   :  { %s3458_s27 = scalar_lea.vmem %s56_s21, 256  ;;  %p3463_p6 = scmp.lt.s32.totalorder %s56_s21, %s56_s21 }
  0x10   :  { %p3459_p5 = scmp.ne.s32.totalorder %s56_s21, %s3458_s27  ;;  %p3464_p7 = scmp.lt.s32.totalorder %s3458_s27, %s3458_s27 }
  0x12   :  { %p3465_p8 = por %p3464_p7, %p3463_p6 }
  0x14   :  { %p3466_p9 = pnand %p3465_p8, %p3459_p5 }
  0x16   :  { %3469 = shalt.err (!%p3466_p9)
}
  0x17   :  { %61 = dma.hbm_to_vmem [thread:$0]  %s3964_s3, 256, %s56_s21, [#allocation9], %s3560_s23, %s3560_s23, %s3561_s24  }
  0x18   :  { %s3562_s30 = smov [#allocation2]   ;;  %s3563_s7 = smov [#allocation7]  }
  0x19   :  { %s19_s6 = sshll.u32 %s3562_s30, 4  ;;  %s43_s8 = sshll.u32 %s3563_s7, 4  ;;  %s20_s6 = int_to_ptr.vmem [resolvable:$true] %s19_s6  ;;  %s44_s8 = int_to_ptr.vmem [resolvable:$true] %s43_s8 }
  0x1a   :  { %s3478_s1 = scalar_lea.vmem %s20_s6, 256  ;;  %p3483_p11 = scmp.lt.s32.totalorder %s20_s6, %s20_s6 }
  0x1b   :  { %p3479_p10 = scmp.ne.s32.totalorder %s20_s6, %s3478_s1  ;;  %p3484_p12 = scmp.lt.s32.totalorder %s3478_s1, %s3478_s1 }
  0x1d   :  { %p3485_p13 = por %p3484_p12, %p3483_p11 }
  0x1f   :  { %p3486_p0 = pnand %p3485_p13, %p3479_p10 }
  0x21   :  { %3489 = shalt.err (!%p3486_p0)
}
  0x22   :  { %25 = dma.hbm_to_vmem [thread:$0]  %s3961_s0, 256, %s20_s6, [#allocation3], %s3560_s23, %s3560_s23, %s3561_s24  }
  0x23   :  { %s3498_s3 = scalar_lea.vmem %s44_s8, 1024  ;;  %p3503_p2 = scmp.lt.s32.totalorder %s44_s8, %s44_s8 }
  0x24   :  { %p3499_p1 = scmp.ne.s32.totalorder %s44_s8, %s3498_s3  ;;  %p3504_p3 = scmp.lt.s32.totalorder %s3498_s3, %s3498_s3 }
  0x26   :  { %p3505_p4 = por %p3504_p3, %p3503_p2 }
  0x28   :  { %p3506_p5 = pnand %p3505_p4, %p3499_p1 }
  0x2a   :  { %3509 = shalt.err (!%p3506_p5)
}
  0x2b   :  { %49 = dma.hbm_to_vmem [thread:$0]  %s3963_s2, 1024, %s44_s8, [#allocation6], %s3560_s23, %s3560_s23, %s3561_s24  }
  0x2c   :  { %s3564_s13 = smov [#allocation10]  }
  0x2d   :  { %s67_s14 = sshll.u32 %s3564_s13, 4  ;;  %s68_s14 = int_to_ptr.vmem [resolvable:$true] %s67_s14 }
  0x2e   :  { %s3518_s15 = scalar_lea.vmem %s68_s14, 640  ;;  %p3523_p7 = scmp.lt.s32.totalorder %s68_s14, %s68_s14 }
  0x2f   :  { %p3519_p6 = scmp.ne.s32.totalorder %s68_s14, %s3518_s15  ;;  %p3524_p8 = scmp.lt.s32.totalorder %s3518_s15, %s3518_s15 }
  0x31   :  { %p3525_p9 = por %p3524_p8, %p3523_p7 }
  0x33   :  { %p3526_p10 = pnand %p3525_p9, %p3519_p6 }
  0x35   :  { %3529 = shalt.err (!%p3526_p10)
}
  0x36   :  { %73 = dma.hbm_to_vmem [thread:$0]  %s3965_s4, 640, %s68_s14, [#allocation9], %s3560_s23, %s3560_s23, %s3561_s24  }
  0x37   :  { %3550 = dma.done.wait [#allocation3], 256  }
  0x38   :  { %3551 = vsyncadd [#allocation3], 4294967040 }
  0x39   :  { %3552 = dma.done.wait [#allocation6], 1280  }
  0x3a   :  { %3553 = vsyncadd [#allocation6], 4294966016 }
  0x3b   :  { %3554 = dma.done.wait [#allocation9], 896  }
  0x3c   :  { %3555 = vsyncadd [#allocation9], 4294966400  ;;  %vm111_vm0 = vcmask 261120   ;;  %v3629_v0 = vld [vmem:[#allocation2] sm:$0xff]  ;;  %v3631_v1 = vld [vmem:[#allocation2 + $0x8] sm:$0xff]  ;;  %v3565_v14 = vmov 0.0   ;;  %v139_v19 = vlaneseq }
  0x3d   :  { %v112_v2 = vsel %vm111_vm0, %v3629_v0, 0.0  ;;  %v115_v3 = vsel %vm111_vm0, %v3631_v1, 0.0  ;;  %3160 = vmatprep.subr.mxu0 %v3565_v14  ;;  %3175 = vmatprep.subr.mxu1 %v3565_v14  ;;  %vm3566_vm1 = vmmov 0   ;;  %v3650_v24 = vld [vmem:[#allocation8] sm:$0xff]  ;;  %v94_v37 = vld [vmem:[#allocation8 + $0x8] sm:$0x3] }
  0x3e   :  { %113 = vadd.xlane.f32.xlu0 %v112_v2  ;;  %3162 = vmatprep.mubr.msk.f32.mxu0 %vm3566_vm1, %v3565_v14  ;;  %v3647_v22 = vshrl.u32 %v139_v19, 7  ;;  %v104_v36 = vrot.slane %v3650_v24, 1  ;;  %v107_v42 = vrot.slane %v94_v37, 2  ;;  %v109_v47 = vrot.slane %v94_v37, 3  ;;  %v95_v55 = vld [vmem:[#allocation7] sm:$0xff]  ;;  %v96_v59 = vld [vmem:[#allocation7 + $0x8] sm:$0xff] }
  0x3f   :  { %3177 = vmatprep.mubr.msk.f32.mxu1 %vm3566_vm1, %v3565_v14  ;;  %vm767_vm2 = vcmask 64512   ;;  %v98_v62 = vld [vmem:[#allocation7 + $0x18] sm:$0xff]  ;;  %s3567_s2 = smov 64   ;;  %vm2908_vm3 = vcmask 523264   ;;  %s3568_s4 = smov [#allocation11]  }
  0x40   :  { %v141_v23 = vsub.s32 0, %v3647_v22  ;;  %v147_v25 = vsub.s32 1, %v3647_v22  ;;  %v155_v27 = vsub.s32 6, %v3647_v22  ;;  %v102_v19 = vld [vmem:[#allocation7 + $0x38] sm:$0xff]  ;;  %s3013_s17 = sshll.u32 %s3568_s4, 4  ;;  %s3014_s17 = int_to_ptr.vmem [resolvable:$true] %s3013_s17 }
  0x41   :  { %s3530_s18 = scalar_lea.vmem %s3014_s17, 256  ;;  %p3535_p12 = scmp.lt.s32.totalorder %s3014_s17, %s3014_s17 }
  0x42   :  { %116 = vadd.xlane.f32.xlu0 %v115_v3  ;;  %v142_v26 = vrot.slane %v3650_v24, %v141_v23  ;;  %v148_v30 = vrot.slane %v3650_v24, %v147_v25  ;;  %v3657_v32 = vrot.slane %v3650_v24, %v155_v27  ;;  %v3662_v41 = vrot.slane %v104_v36, %v155_v27  ;;  %p3531_p11 = scmp.ne.s32.totalorder %s3014_s17, %s3530_s18  ;;  %p3536_p13 = scmp.lt.s32.totalorder %s3530_s18, %s3530_s18 }
  0x43   :  { %v3673_v46 = vrot.slane %v107_v42, %v155_v27  ;;  %v3691_v51 = vrot.slane %v109_v47, %v155_v27  ;;  %v101_v27 = vld [vmem:[#allocation7 + $0x30] sm:$0xff] }
  0x44   :  { %p3537_p0 = por %p3536_p13, %p3535_p12 }
  0x46   :  { %p3538_p1 = pnand %p3537_p0, %p3531_p11 }
  0xc7   :  { %v114_v4 = vpop.xlane.xlu0 %113 }
  0xc8   :  { %v119_v5 = vmul.f32 0.03125, %v114_v4 }
  0xca   :  { %v121_v6 = vsub.f32 %v3629_v0, %v119_v5  ;;  %v97_v5 = vld [vmem:[#allocation7 + $0x10] sm:$0xff] }
  0xcb   :  { %v117_v7 = vpop.xlane.xlu0 %116 }
  0xcc   :  { %v120_v8 = vmul.f32 0.03125, %v117_v7  ;;  %v123_v9 = vmul.f32 %v121_v6, %v121_v6 }
  0xce   :  { %v122_v10 = vsub.f32 %v3631_v1, %v120_v8  ;;  %v125_v11 = vsel %vm111_vm0, %v123_v9, 0.0  ;;  %v100_v8 = vld [vmem:[#allocation7 + $0x28] sm:$0xff] }
  0xcf   :  { %126 = vadd.xlane.f32.xlu1 %v125_v11 }
  0xd0   :  { %v124_v12 = vmul.f32 %v122_v10, %v122_v10 }
  0xd2   :  { %v128_v13 = vsel %vm111_vm0, %v124_v12, 0.0 }
  0xd3   :  { %129 = vadd.xlane.f32.xlu1 %v128_v13 }
 0x158   :  { %v127_v15 = vpop.xlane.xlu1 %126 }
 0x159   :  { %v131_v16 = vmul.f32 0.03125, %v127_v15  ;;  %v99_v15 = vld [vmem:[#allocation7 + $0x20] sm:$0xff] }
 0x15b   :  { %v133_v17 = vadd.f32 1e-05, %v131_v16 }
 0x15c   :  { %v130_v18 = vpop.xlane.xlu1 %129 }
 0x15d   :  { %3353 = vrsqrt.f32 %v133_v17  ;;  %v132_v20 = vmul.f32 0.03125, %v130_v18 }
 0x15f   :  { %v134_v21 = vadd.f32 1e-05, %v132_v20 }
 0x161   :  { %3355 = vrsqrt.f32 %v134_v21 }
 0x16a   :  { %v3354_v28 = vpop.eup %3353 }
 0x16b   :  { %v137_v29 = vmul.f32 %v3354_v28, %v121_v6 }
 0x16d   :  { %v143_v31 = vmul.f32 %v142_v26, %v137_v29 }
 0x16e   :  { %v3356_v33 = vpop.eup %3355 }
 0x16f   :  { %v138_v34 = vmul.f32 %v3356_v33, %v122_v10  ;;  %v149_v35 = vadd.f32 %v148_v30, %v143_v31 }
 0x171   :  { %v144_v38 = vmul.f32 %v142_v26, %v138_v34  ;;  %v169_v39 = vmul.f32 %v3657_v32, %v149_v35  ;;  %v151_v43 = vmul.f32 0.35355338, %v149_v35  ;;  %v3680_v49 = vmul.f32 %v3662_v41, %v149_v35 }
 0x172   :  { %v3700_v52 = vmul.f32 %v3673_v46, %v149_v35  ;;  %v3718_v54 = vmul.f32 %v3691_v51, %v149_v35 }
 0x173   :  { %v150_v40 = vadd.f32 %v148_v30, %v144_v38  ;;  %3161 = vmatpush3.xpose.msk.msra.mxu0 %vm111_vm0, %v169_v39 }
 0x174   :  { %3165 = vmatprep.subr.mxu0 %v3565_v14 }
 0x175   :  { %v170_v44 = vmul.f32 %v3657_v32, %v150_v40  ;;  %v3667_v45 = vmul.f32 %v3662_v41, %v150_v40  ;;  %v152_v48 = vmul.f32 0.35355338, %v150_v40  ;;  %v3683_v50 = vmul.f32 %v3673_v46, %v150_v40 }
 0x176   :  { %3163 = vmatmul.mubr.msk.f32.vlgmr.msra.gmra.mxu0 %vm111_vm0, %v151_v43  ;;  %v3703_v53 = vmul.f32 %v3691_v51, %v150_v40 }
 0x177   :  { %3166 = vmatpush3.xpose.msk.msra.mxu0 %vm111_vm0, %v170_v44  ;;  %3176 = vmatpush3.xpose.msk.msra.mxu1 %vm111_vm0, %v3667_v45 }
 0x178   :  { %3167 = vmatprep.mubr.msk.f32.mxu0 %vm3566_vm1, %v3565_v14  ;;  %3170 = vmatprep.subr.mxu0 %v3565_v14 }
 0x179   :  { %3185 = vmatprep.subr.mxu1 %v3565_v14 }
 0x17a   :  { %3168 = vmatmul.mubr.msk.f32.vlgmr.msra.gmra.mxu0 %vm111_vm0, %v152_v48  ;;  %3178 = vmatmul.mubr.msk.f32.vlgmr.msra.gmra.mxu1 %vm111_vm0, %v152_v48 }
 0x17b   :  { %3171 = vmatpush3.xpose.msk.msra.mxu0 %vm111_vm0, %v3680_v49  ;;  %3186 = vmatpush3.xpose.msk.msra.mxu1 %vm111_vm0, %v3683_v50 }
 0x17c   :  { %3172 = vmatprep.mubr.msk.f32.mxu0 %vm3566_vm1, %v3565_v14  ;;  %3187 = vmatprep.mubr.msk.f32.mxu1 %vm3566_vm1, %v3565_v14 }
 0x17d   :  { %3180 = vmatprep.subr.mxu0 %v3565_v14  ;;  %3195 = vmatprep.subr.mxu1 %v3565_v14 }
 0x17e   :  { %3173 = vmatmul.mubr.msk.f32.vlgmr.msra.gmra.mxu0 %vm111_vm0, %v151_v43  ;;  %3188 = vmatmul.mubr.msk.f32.vlgmr.msra.gmra.mxu1 %vm111_vm0, %v152_v48 }
 0x17f   :  { %3181 = vmatpush3.xpose.msk.msra.mxu0 %vm111_vm0, %v3700_v52  ;;  %3196 = vmatpush3.xpose.msk.msra.mxu1 %vm111_vm0, %v3703_v53 }
 0x180   :  { %3182 = vmatprep.mubr.msk.f32.mxu0 %vm3566_vm1, %v3565_v14  ;;  %3197 = vmatprep.mubr.msk.f32.mxu1 %vm3566_vm1, %v3565_v14 }
 0x181   :  { %3190 = vmatprep.subr.mxu0 %v3565_v14  ;;  %3205 = vmatprep.subr.mxu1 %v3565_v14 }
 0x182   :  { %3183 = vmatmul.mubr.msk.f32.vlgmr.msra.gmra.mxu0 %vm111_vm0, %v151_v43  ;;  %3198 = vmatmul.mubr.msk.f32.vlgmr.msra.gmra.mxu1 %vm111_vm0, %v152_v48 }
 0x183   :  { %3191 = vmatpush3.xpose.msk.msra.mxu0 %vm111_vm0, %v3718_v54  ;;  %3206 = vmatpush3.msra.mxu1 %v170_v44 }
 0x184   :  { %3192 = vmatprep.mubr.msk.f32.mxu0 %vm3566_vm1, %v3565_v14  ;;  %3200 = vmatprep.subr.mxu0 %v3565_v14 }
 0x185   :  { %3207 = vmatprep.mubr.msk.f32.mxu1 %vm3566_vm1, %v3565_v14  ;;  %3215 = vmatprep.subr.mxu1 %v3565_v14 }
 0x186   :  { %3193 = vmatmul.mubr.msk.f32.vlgmr.msra.gmra.mxu0 %vm111_vm0, %v151_v43 }
 0x187   :  { %3201 = vmatpush3.msra.mxu0 %v169_v39  ;;  %3202 = vmatprep.mubr.msk.f32.mxu0 %vm3566_vm1, %v3565_v14 }
 0x188   :  { %3210 = vmatprep.subr.mxu0 %v3565_v14 }
 0x236   :  { %v249_v56 = vpop.f32.mrf.mxu0 }
 0x237   :  { %v250_v57 = vadd.f32 %v249_v56, %v95_v55 }
 0x238   :  { %v3164_v58 = vpop.f32.mrf.mxu0 }
 0x239   :  { %v768_v60 = vsel %vm767_vm2, %v250_v57, -inf }
 0x23a   :  { %769 = vmax.xlane.f32.xlu0 %v768_v60  ;;  %v325_v61 = vpop.f32.mrf.mxu0  ;;  %v471_v63 = vpop.f32.mrf.mxu1 }
 0x23b   :  { %v326_v2 = vadd.f32 %v325_v61, %v96_v59  ;;  %v472_v6 = vadd.f32 %v471_v63, %v98_v62 }
 0x23c   :  { %v3169_v3 = vpop.f32.mrf.mxu0  ;;  %v3179_v4 = vpop.f32.mrf.mxu1 }
 0x23d   :  { %v771_v7 = vsel %vm767_vm2, %v326_v2, -inf  ;;  %v777_v17 = vsel %vm767_vm2, %v472_v6, -inf }
 0x23e   :  { %v617_v9 = vpop.f32.mrf.mxu1  ;;  %772 = vmax.xlane.f32.xlu1 %v771_v7  ;;  %v398_v10 = vpop.f32.mrf.mxu0 }
 0x23f   :  { %v399_v11 = vadd.f32 %v398_v10, %v97_v5  ;;  %v618_v16 = vadd.f32 %v617_v9, %v100_v8 }
 0x240   :  { %v3174_v12 = vpop.f32.mrf.mxu0  ;;  %v3189_v13 = vpop.f32.mrf.mxu1 }
 0x241   :  { %v774_v18 = vsel %vm767_vm2, %v399_v11, -inf  ;;  %v783_v29 = vsel %vm767_vm2, %v618_v16, -inf }
 0x242   :  { %v763_v20 = vpop.f32.mrf.mxu1  ;;  %778 = vmax.xlane.f32.xlu1 %v777_v17  ;;  %775 = vmax.xlane.f32.xlu0 %v774_v18  ;;  %v544_v21 = vpop.f32.mrf.mxu0 }
 0x243   :  { %v545_v23 = vadd.f32 %v544_v21, %v99_v15  ;;  %v764_v28 = vadd.f32 %v763_v20, %v102_v19 }
 0x244   :  { %v3184_v25 = vpop.f32.mrf.mxu0  ;;  %v3199_v26 = vpop.f32.mrf.mxu1 }
 0x245   :  { %v780_v30 = vsel %vm767_vm2, %v545_v23, -inf  ;;  %v789_v35 = vsel %vm767_vm2, %v764_v28, -inf }
 0x246   :  { %784 = vmax.xlane.f32.xlu1 %v783_v29  ;;  %781 = vmax.xlane.f32.xlu0 %v780_v30  ;;  %v690_v31 = vpop.f32.mrf.mxu0 }
 0x247   :  { %v691_v33 = vadd.f32 %v690_v31, %v101_v27 }
 0x248   :  { %v3194_v34 = vpop.f32.mrf.mxu0 }
 0x249   :  { %v786_v36 = vsel %vm767_vm2, %v691_v33, -inf }
 0x24a   :  { %790 = vmax.xlane.f32.xlu1 %v789_v35  ;;  %787 = vmax.xlane.f32.xlu0 %v786_v36 }
 0x2c3   :  { %v770_v37 = vpop.xlane.xlu0 %769 }
 0x2c4   :  { %v792_v38 = vsub.f32 %v250_v57, %v770_v37 }
 0x2c6   :  { %v800_v39 = vmul.f32 1.442695, %v792_v38 }
 0x2c7   :  { %v773_v40 = vpop.xlane.xlu1 %772 }
 0x2c8   :  { %3357 = vpow2.f32 %v800_v39  ;;  %v793_v42 = vsub.f32 %v326_v2, %v773_v40 }
 0x2ca   :  { %v802_v43 = vmul.f32 1.442695, %v793_v42 }
 0x2cb   :  { %v779_v44 = vpop.xlane.xlu1 %778  ;;  %v776_v47 = vpop.xlane.xlu0 %775 }
 0x2cc   :  { %3359 = vpow2.f32 %v802_v43  ;;  %v795_v48 = vsub.f32 %v472_v6, %v779_v44  ;;  %v794_v55 = vsub.f32 %v399_v11, %v776_v47 }
 0x2ce   :  { %v806_v56 = vmul.f32 1.442695, %v795_v48  ;;  %v804_v58 = vmul.f32 1.442695, %v794_v55 }
 0x2cf   :  { %v785_v59 = vpop.xlane.xlu1 %784  ;;  %v782_v60 = vpop.xlane.xlu0 %781 }
 0x2d0   :  { %3361 = vpow2.f32 %v806_v56  ;;  %v797_v61 = vsub.f32 %v618_v16, %v785_v59  ;;  %v796_v62 = vsub.f32 %v545_v23, %v782_v60 }
 0x2d1   :  { %3363 = vpow2.f32 %v804_v58 }
 0x2d2   :  { %v810_v63 = vmul.f32 1.442695, %v797_v61  ;;  %v808_v57 = vmul.f32 1.442695, %v796_v62 }
 0x2d3   :  { %v791_v3 = vpop.xlane.xlu1 %790  ;;  %v788_v4 = vpop.xlane.xlu0 %787 }
 0x2d4   :  { %3365 = vpow2.f32 %v810_v63  ;;  %v799_v2 = vsub.f32 %v764_v28, %v791_v3  ;;  %v798_v5 = vsub.f32 %v691_v33, %v788_v4 }
 0x2d5   :  { %v3358_v7 = vpop.eup %3357  ;;  %3367 = vpow2.f32 %v808_v57 }
 0x2d6   :  { %v814_v8 = vmul.f32 1.442695, %v799_v2  ;;  %v812_v6 = vmul.f32 1.442695, %v798_v5  ;;  %v816_v9 = vsel %vm767_vm2, %v3358_v7, 0.0 }
 0x2d7   :  { %817 = vadd.xlane.f32.xlu0 %v816_v9 }
 0x2d8   :  { %3369 = vpow2.f32 %v814_v8 }
 0x2d9   :  { %v3360_v10 = vpop.eup %3359  ;;  %3371 = vpow2.f32 %v812_v6 }
 0x2da   :  { %v819_v11 = vsel %vm767_vm2, %v3360_v10, 0.0 }
 0x2db   :  { %820 = vadd.xlane.f32.xlu1 %v819_v11 }
 0x2dd   :  { %v3362_v12 = vpop.eup %3361 }
 0x2de   :  { %v3364_v13 = vpop.eup %3363  ;;  %v825_v15 = vsel %vm767_vm2, %v3362_v12, 0.0 }
 0x2df   :  { %826 = vadd.xlane.f32.xlu1 %v825_v15  ;;  %v822_v16 = vsel %vm767_vm2, %v3364_v13, 0.0 }
 0x2e0   :  { %823 = vadd.xlane.f32.xlu0 %v822_v16 }
 0x2e1   :  { %v3366_v17 = vpop.eup %3365 }
 0x2e2   :  { %v3368_v18 = vpop.eup %3367  ;;  %v831_v19 = vsel %vm767_vm2, %v3366_v17, 0.0 }
 0x2e3   :  { %832 = vadd.xlane.f32.xlu1 %v831_v19  ;;  %v828_v20 = vsel %vm767_vm2, %v3368_v18, 0.0 }
 0x2e4   :  { %829 = vadd.xlane.f32.xlu0 %v828_v20 }
 0x2e5   :  { %v3370_v21 = vpop.eup %3369 }
 0x2e6   :  { %v3372_v23 = vpop.eup %3371  ;;  %v837_v25 = vsel %vm767_vm2, %v3370_v21, 0.0 }
 0x2e7   :  { %838 = vadd.xlane.f32.xlu1 %v837_v25  ;;  %v834_v26 = vsel %vm767_vm2, %v3372_v23, 0.0 }
 0x2e8   :  { %835 = vadd.xlane.f32.xlu0 %v834_v26 }
 0x360   :  { %v818_v27 = vpop.xlane.xlu0 %817 }
 0x361   :  { %3373 = vrcp.f32 %v818_v27 }
 0x364   :  { %v821_v28 = vpop.xlane.xlu1 %820 }
 0x365   :  { %3375 = vrcp.f32 %v821_v28 }
 0x368   :  { %v827_v29 = vpop.xlane.xlu1 %826 }
 0x369   :  { %3377 = vrcp.f32 %v827_v29  ;;  %v824_v30 = vpop.xlane.xlu0 %823 }
 0x36a   :  { %3379 = vrcp.f32 %v824_v30  ;;  %v91_v30 = vld [vmem:[#allocation5] sm:$0xff] }
 0x36c   :  { %v833_v31 = vpop.xlane.xlu1 %832 }
 0x36d   :  { %3381 = vrcp.f32 %v833_v31  ;;  %v830_v33 = vpop.xlane.xlu0 %829  ;;  %v92_v31 = vld [vmem:[#allocation5 + $0x8] sm:$0xff] }
 0x36e   :  { %v3374_v34 = vpop.eup %3373  ;;  %3383 = vrcp.f32 %v830_v33  ;;  %v1488_v33 = vmul.f32 %v3657_v32, %v91_v30 }
 0x36f   :  { %v841_v35 = vmul.f32 %v3374_v34, %v3358_v7  ;;  %v1489_v34 = vmul.f32 %v3657_v32, %v92_v31  ;;  %v1482_v32 = vsub.s32 3, %v3647_v22 }
 0x370   :  { %v839_v36 = vpop.xlane.xlu1 %838 }
 0x371   :  { %3385 = vrcp.f32 %v839_v36  ;;  %v836_v37 = vpop.xlane.xlu0 %835  ;;  %3203 = vmatmul.mubr.msk.f32.vlgmr.msra.gmra.mxu0 %vm767_vm2, %v841_v35 }
 0x372   :  { %v3376_v38 = vpop.eup %3375  ;;  %3387 = vrcp.f32 %v836_v37  ;;  %3211 = vmatpush3.msra.mxu0 %v3680_v49  ;;  %3212 = vmatprep.mubr.msk.f32.mxu0 %vm3566_vm1, %v3565_v14 }
 0x373   :  { %v843_v39 = vmul.f32 %v3376_v38, %v3360_v10  ;;  %3220 = vmatprep.subr.mxu0 %v3565_v14 }
 0x375   :  { %3208 = vmatmul.mubr.msk.f32.vlgmr.msra.gmra.mxu1 %vm767_vm2, %v843_v39 }
 0x376   :  { %v3378_v40 = vpop.eup %3377  ;;  %3216 = vmatpush3.msra.mxu1 %v3667_v45  ;;  %3217 = vmatprep.mubr.msk.f32.mxu1 %vm3566_vm1, %v3565_v14 }
 0x377   :  { %v3380_v42 = vpop.eup %3379  ;;  %3225 = vmatprep.subr.mxu1 %v3565_v14  ;;  %v847_v43 = vmul.f32 %v3378_v40, %v3362_v12 }
 0x378   :  { %v845_v44 = vmul.f32 %v3380_v42, %v3364_v13  ;;  %v1476_v42 = vsub.s32 2, %v3647_v22 }
 0x379   :  { %3218 = vmatmul.mubr.msk.f32.vlgmr.msra.gmra.mxu1 %vm767_vm2, %v847_v43 }
 0x37a   :  { %v3382_v49 = vpop.eup %3381  ;;  %3213 = vmatmul.mubr.msk.f32.vlgmr.msra.gmra.mxu0 %vm767_vm2, %v845_v44  ;;  %3226 = vmatpush3.msra.mxu1 %v3683_v50  ;;  %v1477_v43 = vrot.slane %v3650_v24, %v1476_v42 }
 0x37b   :  { %v3384_v47 = vpop.eup %3383  ;;  %3221 = vmatpush3.msra.mxu0 %v3700_v52  ;;  %3222 = vmatprep.mubr.msk.f32.mxu0 %vm3566_vm1, %v3565_v14  ;;  %v851_v45 = vmul.f32 %v3382_v49, %v3366_v17 }
 0x37c   :  { %3227 = vmatprep.mubr.msk.f32.mxu1 %vm3566_vm1, %v3565_v14  ;;  %3230 = vmatprep.subr.mxu0 %v3565_v14  ;;  %v849_v48 = vmul.f32 %v3384_v47, %v3368_v18 }
 0x37d   :  { %3235 = vmatprep.subr.mxu1 %v3565_v14  ;;  %3228 = vmatmul.mubr.msk.f32.vlgmr.msra.gmra.mxu1 %vm767_vm2, %v851_v45  ;;  %v1483_v45 = vrot.slane %v3650_v24, %v1482_v32  ;;  %v3821_v24 = vmul.f32 %v3673_v46, %v92_v31 }
 0x37e   :  { %v3386_v55 = vpop.eup %3385  ;;  %3223 = vmatmul.mubr.msk.f32.vlgmr.msra.gmra.mxu0 %vm767_vm2, %v849_v48  ;;  %3236 = vmatpush3.msra.mxu1 %v3703_v53 }
 0x37f   :  { %v3388_v50 = vpop.eup %3387  ;;  %3231 = vmatpush3.msra.mxu0 %v3718_v54  ;;  %3232 = vmatprep.mubr.msk.f32.mxu0 %vm3566_vm1, %v3565_v14  ;;  %v855_v52 = vmul.f32 %v3386_v55, %v3370_v21 }
 0x380   :  { %3237 = vmatprep.mubr.msk.f32.mxu1 %vm3566_vm1, %v3565_v14  ;;  %v853_v56 = vmul.f32 %v3388_v50, %v3372_v23  ;;  %3240 = vmatprep.subr.mxu0 %v3565_v14 }
 0x381   :  { %3238 = vmatmul.mubr.msk.f32.vlgmr.msra.gmra.mxu1 %vm767_vm2, %v855_v52  ;;  %3245 = vmatprep.subr.mxu1 %v3565_v14 }
 0x382   :  { %3233 = vmatmul.mubr.msk.f32.vlgmr.msra.gmra.mxu0 %vm767_vm2, %v853_v56  ;;  %3247 = vmatprep.mubr.msk.f32.mxu1 %vm3566_vm1, %v3565_v14 }
 0x383   :  { %3242 = vmatprep.mubr.msk.f32.mxu0 %vm3566_vm1, %v3565_v14  ;;  %3241 = vmatpush3.xpose.msk.msra.mxu0 %vm111_vm0, %v1488_v33 }
 0x384   :  { %3246 = vmatpush3.xpose.msk.msra.mxu1 %vm111_vm0, %v1489_v34  ;;  %3250 = vmatprep.subr.mxu0 %v3565_v14 }
 0x385   :  { %3255 = vmatprep.subr.mxu1 %v3565_v14 }
 0x431   :  { %v925_v53 = vpop.f32.mrf.mxu0 }
 0x433   :  { %v3204_v54 = vpop.f32.mrf.mxu0 }
 0x435   :  { %v998_v58 = vpop.f32.mrf.mxu1 }
 0x437   :  { %v3209_v59 = vpop.f32.mrf.mxu1 }
 0x439   :  { %v1144_v60 = vpop.f32.mrf.mxu1 }
 0x43a   :  { %v1071_v61 = vpop.f32.mrf.mxu0  ;;  %v1441_v3 = vadd.f32 %v1144_v60, %v998_v58  ;;  %v3814_v58 = vmul.f32 %v3662_v41, %v91_v30  ;;  %v3839_v60 = vmul.f32 %v3691_v51, %v92_v31 }
 0x43b   :  { %v3219_v62 = vpop.f32.mrf.mxu1  ;;  %v1440_v2 = vadd.f32 %v1071_v61, %v925_v53  ;;  %v3811_v53 = vmul.f32 %v3662_v41, %v92_v31  ;;  %v3828_v41 = vmul.f32 %v3673_v46, %v91_v30  ;;  %v3846_v46 = vmul.f32 %v3691_v51, %v91_v30 }
 0x43c   :  { %v3214_v63 = vpop.f32.mrf.mxu0 }
 0x43d   :  { %v1290_v57 = vpop.f32.mrf.mxu1 }
 0x43e   :  { %v1217_v4 = vpop.f32.mrf.mxu0  ;;  %v1443_v7 = vadd.f32 %v1441_v3, %v1290_v57 }
 0x43f   :  { %v3229_v5 = vpop.f32.mrf.mxu1  ;;  %v1442_v6 = vadd.f32 %v1440_v2, %v1217_v4 }
 0x440   :  { %v3224_v8 = vpop.f32.mrf.mxu0 }
 0x441   :  { %v1436_v9 = vpop.f32.mrf.mxu1 }
 0x442   :  { %v1363_v10 = vpop.f32.mrf.mxu0  ;;  %v1445_v11 = vadd.f32 %v1443_v7, %v1436_v9 }
 0x443   :  { %v1444_v12 = vadd.f32 %v1442_v6, %v1363_v10  ;;  %v3239_v13 = vpop.f32.mrf.mxu1 }
 0x444   :  { %v3787_v15 = vadd.f32 %v1445_v11, %v3631_v1  ;;  %v3234_v16 = vpop.f32.mrf.mxu0 }
 0x445   :  { %v3790_v17 = vadd.f32 %v1444_v12, %v3629_v0 }
 0x446   :  { %v1451_v18 = vsel %vm111_vm0, %v3787_v15, 0.0 }
 0x447   :  { %1452 = vadd.xlane.f32.xlu1 %v1451_v18  ;;  %v1448_v19 = vsel %vm111_vm0, %v3790_v17, 0.0 }
 0x448   :  { %1449 = vadd.xlane.f32.xlu0 %v1448_v19 }
 0x4d0   :  { %v1453_v20 = vpop.xlane.xlu1 %1452 }
 0x4d1   :  { %v1455_v21 = vmul.f32 0.03125, %v1453_v20  ;;  %v1450_v23 = vpop.xlane.xlu0 %1449 }
 0x4d2   :  { %v1454_v25 = vmul.f32 0.03125, %v1450_v23 }
 0x4d3   :  { %v1457_v26 = vsub.f32 %v3787_v15, %v1455_v21 }
 0x4d4   :  { %v1456_v1 = vsub.f32 %v3790_v17, %v1454_v25 }
 0x4d5   :  { %v1459_v27 = vmul.f32 %v1457_v26, %v1457_v26 }
 0x4d6   :  { %v1458_v28 = vmul.f32 %v1456_v1, %v1456_v1 }
 0x4d7   :  { %v1463_v0 = vsel %vm111_vm0, %v1459_v27, 0.0 }
 0x4d8   :  { %1464 = vadd.xlane.f32.xlu1 %v1463_v0  ;;  %v1460_v29 = vsel %vm111_vm0, %v1458_v28, 0.0 }
 0x4d9   :  { %1461 = vadd.xlane.f32.xlu0 %v1460_v29 }
 0x561   :  { %v1465_v35 = vpop.xlane.xlu1 %1464 }
 0x562   :  { %v1467_v36 = vmul.f32 0.03125, %v1465_v35  ;;  %v1462_v37 = vpop.xlane.xlu0 %1461 }
 0x563   :  { %v1466_v38 = vmul.f32 0.03125, %v1462_v37 }
 0x564   :  { %v1469_v39 = vadd.f32 1e-05, %v1467_v36 }
 0x565   :  { %v1468_v40 = vadd.f32 1e-05, %v1466_v38 }
 0x566   :  { %3389 = vrsqrt.f32 %v1469_v39 }
 0x567   :  { %3391 = vrsqrt.f32 %v1468_v40 }
 0x573   :  { %v3390_v44 = vpop.eup %3389 }
 0x574   :  { %v3392_v49 = vpop.eup %3391  ;;  %v1473_v47 = vmul.f32 %v3390_v44, %v1457_v26 }
 0x575   :  { %v1472_v48 = vmul.f32 %v3392_v49, %v1456_v1 }
 0x576   :  { %v1479_v55 = vmul.f32 %v1477_v43, %v1473_v47 }
 0x577   :  { %v1478_v50 = vmul.f32 %v1477_v43, %v1472_v48 }
 0x578   :  { %v1485_v52 = vadd.f32 %v1483_v45, %v1479_v55 }
 0x579   :  { %v1484_v56 = vadd.f32 %v1483_v45, %v1478_v50 }
 0x57a   :  { %v1487_v54 = vmul.f32 0.35355338, %v1485_v52 }
 0x57b   :  { %v1486_v59 = vmul.f32 0.35355338, %v1484_v56 }
 0x57c   :  { %3248 = vmatmul.mubr.msk.f32.vlgmr.msra.gmra.mxu1 %vm111_vm0, %v1487_v54 }
 0x57d   :  { %3243 = vmatmul.mubr.msk.f32.vlgmr.msra.gmra.mxu0 %vm111_vm0, %v1486_v59  ;;  %3256 = vmatpush3.xpose.msk.msra.mxu1 %vm111_vm0, %v3811_v53 }
 0x57e   :  { %3251 = vmatpush3.xpose.msk.msra.mxu0 %vm111_vm0, %v3814_v58  ;;  %3252 = vmatprep.mubr.msk.f32.mxu0 %vm3566_vm1, %v3565_v14 }
 0x57f   :  { %3257 = vmatprep.mubr.msk.f32.mxu1 %vm3566_vm1, %v3565_v14  ;;  %3260 = vmatprep.subr.mxu0 %v3565_v14 }
 0x580   :  { %3258 = vmatmul.mubr.msk.f32.vlgmr.msra.gmra.mxu1 %vm111_vm0, %v1487_v54  ;;  %3265 = vmatprep.subr.mxu1 %v3565_v14 }
 0x581   :  { %3253 = vmatmul.mubr.msk.f32.vlgmr.msra.gmra.mxu0 %vm111_vm0, %v1486_v59  ;;  %3266 = vmatpush3.xpose.msk.msra.mxu1 %vm111_vm0, %v3821_v24 }
 0x582   :  { %3261 = vmatpush3.xpose.msk.msra.mxu0 %vm111_vm0, %v3828_v41  ;;  %3262 = vmatprep.mubr.msk.f32.mxu0 %vm3566_vm1, %v3565_v14 }
 0x583   :  { %3267 = vmatprep.mubr.msk.f32.mxu1 %vm3566_vm1, %v3565_v14  ;;  %3270 = vmatprep.subr.mxu0 %v3565_v14 }
 0x584   :  { %3268 = vmatmul.mubr.msk.f32.vlgmr.msra.gmra.mxu1 %vm111_vm0, %v1487_v54  ;;  %3275 = vmatprep.subr.mxu1 %v3565_v14 }
 0x585   :  { %3263 = vmatmul.mubr.msk.f32.vlgmr.msra.gmra.mxu0 %vm111_vm0, %v1486_v59  ;;  %3276 = vmatpush3.xpose.msk.msra.mxu1 %vm111_vm0, %v3839_v60 }
 0x586   :  { %3271 = vmatpush3.xpose.msk.msra.mxu0 %vm111_vm0, %v3846_v46  ;;  %3272 = vmatprep.mubr.msk.f32.mxu0 %vm3566_vm1, %v3565_v14 }
 0x587   :  { %3277 = vmatprep.mubr.msk.f32.mxu1 %vm3566_vm1, %v3565_v14  ;;  %3280 = vmatprep.subr.mxu0 %v3565_v14 }
 0x588   :  { %3278 = vmatmul.mubr.msk.f32.vlgmr.msra.gmra.mxu1 %vm111_vm0, %v1487_v54  ;;  %3285 = vmatprep.subr.mxu1 %v3565_v14 }
 0x589   :  { %3273 = vmatmul.mubr.msk.f32.vlgmr.msra.gmra.mxu0 %vm111_vm0, %v1486_v59  ;;  %3286 = vmatpush3.msra.mxu1 %v1489_v34 }
 0x58a   :  { %3281 = vmatpush3.msra.mxu0 %v1488_v33  ;;  %3282 = vmatprep.mubr.msk.f32.mxu0 %vm3566_vm1, %v3565_v14 }
 0x58b   :  { %3287 = vmatprep.mubr.msk.f32.mxu1 %vm3566_vm1, %v3565_v14  ;;  %3290 = vmatprep.subr.mxu0 %v3565_v14 }
 0x58c   :  { %3295 = vmatprep.subr.mxu1 %v3565_v14 }
 0x63c   :  { %v1644_v51 = vpop.f32.mrf.mxu1 }
 0x63d   :  { %v1568_v61 = vpop.f32.mrf.mxu0  ;;  %v2089_v62 = vsel %vm767_vm2, %v1644_v51, -inf }
 0x63e   :  { %2090 = vmax.xlane.f32.xlu1 %v2089_v62  ;;  %v3249_v63 = vpop.f32.mrf.mxu1  ;;  %v2086_v57 = vsel %vm767_vm2, %v1568_v61, -inf }
 0x63f   :  { %2087 = vmax.xlane.f32.xlu0 %v2086_v57  ;;  %v3244_v3 = vpop.f32.mrf.mxu0 }
 0x640   :  { %v1790_v4 = vpop.f32.mrf.mxu1 }
 0x641   :  { %v1717_v2 = vpop.f32.mrf.mxu0  ;;  %v2095_v5 = vsel %vm767_vm2, %v1790_v4, -inf }
 0x642   :  { %2096 = vmax.xlane.f32.xlu1 %v2095_v5  ;;  %v3259_v7 = vpop.f32.mrf.mxu1  ;;  %v2092_v8 = vsel %vm767_vm2, %v1717_v2, -inf }
 0x643   :  { %2093 = vmax.xlane.f32.xlu0 %v2092_v8  ;;  %v3254_v6 = vpop.f32.mrf.mxu0 }
 0x644   :  { %v1936_v9 = vpop.f32.mrf.mxu1 }
 0x645   :  { %v1863_v10 = vpop.f32.mrf.mxu0  ;;  %v2101_v11 = vsel %vm767_vm2, %v1936_v9, -inf }
 0x646   :  { %2102 = vmax.xlane.f32.xlu1 %v2101_v11  ;;  %v3269_v12 = vpop.f32.mrf.mxu1  ;;  %v2098_v13 = vsel %vm767_vm2, %v1863_v10, -inf }
 0x647   :  { %2099 = vmax.xlane.f32.xlu0 %v2098_v13  ;;  %v3264_v16 = vpop.f32.mrf.mxu0 }
 0x648   :  { %v2082_v18 = vpop.f32.mrf.mxu1 }
 0x649   :  { %v2009_v19 = vpop.f32.mrf.mxu0  ;;  %v2107_v20 = vsel %vm767_vm2, %v2082_v18, -inf }
 0x64a   :  { %2108 = vmax.xlane.f32.xlu1 %v2107_v20  ;;  %v3279_v21 = vpop.f32.mrf.mxu1  ;;  %v2104_v23 = vsel %vm767_vm2, %v2009_v19, -inf }
 0x64b   :  { %2105 = vmax.xlane.f32.xlu0 %v2104_v23  ;;  %v3274_v25 = vpop.f32.mrf.mxu0 }
 0x6c7   :  { %v2091_v26 = vpop.xlane.xlu1 %2090 }
 0x6c8   :  { %v2111_v1 = vsub.f32 %v1644_v51, %v2091_v26  ;;  %v2088_v27 = vpop.xlane.xlu0 %2087 }
 0x6c9   :  { %v2110_v28 = vsub.f32 %v1568_v61, %v2088_v27 }
 0x6ca   :  { %v2120_v0 = vmul.f32 1.442695, %v2111_v1 }
 0x6cb   :  { %v2118_v29 = vmul.f32 1.442695, %v2110_v28  ;;  %v2097_v30 = vpop.xlane.xlu1 %2096 }
 0x6cc   :  { %3393 = vpow2.f32 %v2120_v0  ;;  %v2113_v31 = vsub.f32 %v1790_v4, %v2097_v30  ;;  %v2094_v33 = vpop.xlane.xlu0 %2093 }
 0x6cd   :  { %3395 = vpow2.f32 %v2118_v29  ;;  %v2112_v34 = vsub.f32 %v1717_v2, %v2094_v33 }
 0x6ce   :  { %v2124_v35 = vmul.f32 1.442695, %v2113_v31 }
 0x6cf   :  { %v2122_v36 = vmul.f32 1.442695, %v2112_v34  ;;  %v2103_v37 = vpop.xlane.xlu1 %2102 }
 0x6d0   :  { %3397 = vpow2.f32 %v2124_v35  ;;  %v2115_v38 = vsub.f32 %v1936_v9, %v2103_v37  ;;  %v2100_v39 = vpop.xlane.xlu0 %2099 }
 0x6d1   :  { %3399 = vpow2.f32 %v2122_v36  ;;  %v2114_v40 = vsub.f32 %v1863_v10, %v2100_v39 }
 0x6d2   :  { %v2128_v42 = vmul.f32 1.442695, %v2115_v38 }
 0x6d3   :  { %v2126_v32 = vmul.f32 1.442695, %v2114_v40  ;;  %v2109_v43 = vpop.xlane.xlu1 %2108 }
 0x6d4   :  { %3401 = vpow2.f32 %v2128_v42  ;;  %v2117_v44 = vsub.f32 %v2082_v18, %v2109_v43  ;;  %v2106_v49 = vpop.xlane.xlu0 %2105 }
 0x6d5   :  { %3403 = vpow2.f32 %v2126_v32  ;;  %v2116_v47 = vsub.f32 %v2009_v19, %v2106_v49 }
 0x6d6   :  { %v2132_v45 = vmul.f32 1.442695, %v2117_v44 }
 0x6d7   :  { %v2130_v48 = vmul.f32 1.442695, %v2116_v47 }
 0x6d8   :  { %3405 = vpow2.f32 %v2132_v45 }
 0x6d9   :  { %v3394_v55 = vpop.eup %3393  ;;  %3407 = vpow2.f32 %v2130_v48 }
 0x6da   :  { %v3396_v50 = vpop.eup %3395  ;;  %v2137_v52 = vsel %vm767_vm2, %v3394_v55, 0.0 }
 0x6db   :  { %2138 = vadd.xlane.f32.xlu1 %v2137_v52  ;;  %v2134_v56 = vsel %vm767_vm2, %v3396_v50, 0.0 }
 0x6dc   :  { %2135 = vadd.xlane.f32.xlu0 %v2134_v56 }
 0x6dd   :  { %v3398_v54 = vpop.eup %3397 }
 0x6de   :  { %v3400_v59 = vpop.eup %3399  ;;  %v2143_v51 = vsel %vm767_vm2, %v3398_v54, 0.0 }
 0x6df   :  { %2144 = vadd.xlane.f32.xlu1 %v2143_v51  ;;  %v2140_v61 = vsel %vm767_vm2, %v3400_v59, 0.0 }
 0x6e0   :  { %2141 = vadd.xlane.f32.xlu0 %v2140_v61 }
 0x6e1   :  { %v3402_v62 = vpop.eup %3401 }
 0x6e2   :  { %v3404_v63 = vpop.eup %3403  ;;  %v2149_v57 = vsel %vm767_vm2, %v3402_v62, 0.0 }
 0x6e3   :  { %2150 = vadd.xlane.f32.xlu1 %v2149_v57  ;;  %v2146_v3 = vsel %vm767_vm2, %v3404_v63, 0.0 }
 0x6e4   :  { %2147 = vadd.xlane.f32.xlu0 %v2146_v3 }
 0x6e5   :  { %v3406_v4 = vpop.eup %3405 }
 0x6e6   :  { %v3408_v2 = vpop.eup %3407  ;;  %v2155_v5 = vsel %vm767_vm2, %v3406_v4, 0.0 }
 0x6e7   :  { %2156 = vadd.xlane.f32.xlu1 %v2155_v5  ;;  %v2152_v7 = vsel %vm767_vm2, %v3408_v2, 0.0  ;;  %v2806_v5 = vld [vmem:[#allocation10 + $0x10] sm:$0xff] }
 0x6e8   :  { %2153 = vadd.xlane.f32.xlu0 %v2152_v7  ;;  %v2805_v7 = vld [vmem:[#allocation10 + $0x8] sm:$0xff] }
 0x764   :  { %v2139_v8 = vpop.xlane.xlu1 %2138 }
 0x765   :  { %3409 = vrcp.f32 %v2139_v8  ;;  %v2136_v6 = vpop.xlane.xlu0 %2135  ;;  %v2804_v8 = vld [vmem:[#allocation10] sm:$0xff] }
 0x766   :  { %3411 = vrcp.f32 %v2136_v6 }
 0x768   :  { %v2145_v9 = vpop.xlane.xlu1 %2144 }
 0x769   :  { %3413 = vrcp.f32 %v2145_v9  ;;  %v2142_v10 = vpop.xlane.xlu0 %2141 }
 0x76a   :  { %3415 = vrcp.f32 %v2142_v10 }
 0x76c   :  { %v2151_v11 = vpop.xlane.xlu1 %2150 }
 0x76d   :  { %3417 = vrcp.f32 %v2151_v11  ;;  %v2148_v12 = vpop.xlane.xlu0 %2147 }
 0x76e   :  { %3419 = vrcp.f32 %v2148_v12 }
 0x770   :  { %v2157_v13 = vpop.xlane.xlu1 %2156 }
 0x771   :  { %3421 = vrcp.f32 %v2157_v13  ;;  %v2154_v16 = vpop.xlane.xlu0 %2153 }
 0x772   :  { %v3410_v18 = vpop.eup %3409  ;;  %3423 = vrcp.f32 %v2154_v16  ;;  %v2794_v16 = vsub.s32 4, %v3647_v22 }
 0x773   :  { %v3412_v19 = vpop.eup %3411  ;;  %v2161_v20 = vmul.f32 %v3410_v18, %v3394_v55 }
 0x774   :  { %v2159_v21 = vmul.f32 %v3412_v19, %v3396_v50 }
 0x775   :  { %3288 = vmatmul.mubr.msk.f32.vlgmr.msra.gmra.mxu1 %vm767_vm2, %v2161_v20  ;;  %v2800_v20 = vsub.s32 5, %v3647_v22 }
 0x776   :  { %v3414_v23 = vpop.eup %3413  ;;  %3283 = vmatmul.mubr.msk.f32.vlgmr.msra.gmra.mxu0 %vm767_vm2, %v2159_v21  ;;  %3296 = vmatpush3.msra.mxu1 %v3811_v53  ;;  %v3429_v21 = vld [vmem:[#allocation8] sm:$0xff] }
 0x777   :  { %v3416_v25 = vpop.eup %3415  ;;  %3291 = vmatpush3.msra.mxu0 %v3814_v58  ;;  %3292 = vmatprep.mubr.msk.f32.mxu0 %vm3566_vm1, %v3565_v14  ;;  %v2165_v26 = vmul.f32 %v3414_v23, %v3398_v54  ;;  %v2795_v23 = vrot.slane %v3429_v21, %v2794_v16 }
 0x778   :  { %3297 = vmatprep.mubr.msk.f32.mxu1 %vm3566_vm1, %v3565_v14  ;;  %v2163_v1 = vmul.f32 %v3416_v25, %v3400_v59  ;;  %3300 = vmatprep.subr.mxu0 %v3565_v14 }
 0x779   :  { %3298 = vmatmul.mubr.msk.f32.vlgmr.msra.gmra.mxu1 %vm767_vm2, %v2165_v26  ;;  %3305 = vmatprep.subr.mxu1 %v3565_v14 }
 0x77a   :  { %v3418_v27 = vpop.eup %3417  ;;  %3293 = vmatmul.mubr.msk.f32.vlgmr.msra.gmra.mxu0 %vm767_vm2, %v2163_v1  ;;  %3306 = vmatpush3.msra.mxu1 %v3821_v24 }
 0x77b   :  { %v3420_v53 = vpop.eup %3419  ;;  %3301 = vmatpush3.msra.mxu0 %v3828_v41  ;;  %3302 = vmatprep.mubr.msk.f32.mxu0 %vm3566_vm1, %v3565_v14  ;;  %v2169_v58 = vmul.f32 %v3418_v27, %v3402_v62 }
 0x77c   :  { %3307 = vmatprep.mubr.msk.f32.mxu1 %vm3566_vm1, %v3565_v14  ;;  %v2167_v28 = vmul.f32 %v3420_v53, %v3404_v63  ;;  %3310 = vmatprep.subr.mxu0 %v3565_v14  ;;  %v2801_v53 = vrot.slane %v3429_v21, %v2800_v20 }
 0x77d   :  { %3308 = vmatmul.mubr.msk.f32.vlgmr.msra.gmra.mxu1 %vm767_vm2, %v2169_v58  ;;  %3315 = vmatprep.subr.mxu1 %v3565_v14 }
 0x77e   :  { %v3422_v0 = vpop.eup %3421  ;;  %3303 = vmatmul.mubr.msk.f32.vlgmr.msra.gmra.mxu0 %vm767_vm2, %v2167_v28  ;;  %3316 = vmatpush3.msra.mxu1 %v3839_v60 }
 0x77f   :  { %v3424_v24 = vpop.eup %3423  ;;  %3311 = vmatpush3.msra.mxu0 %v3846_v46  ;;  %3312 = vmatprep.mubr.msk.f32.mxu0 %vm3566_vm1, %v3565_v14  ;;  %v2173_v41 = vmul.f32 %v3422_v0, %v3406_v4 }
 0x780   :  { %3317 = vmatprep.mubr.msk.f32.mxu1 %vm3566_vm1, %v3565_v14  ;;  %v2171_v29 = vmul.f32 %v3424_v24, %v3408_v2  ;;  %v2807_v2 = vld [vmem:[#allocation10 + $0x18] sm:$0xff] }
 0x781   :  { %3318 = vmatmul.mubr.msk.f32.vlgmr.msra.gmra.mxu1 %vm767_vm2, %v2173_v41  ;;  %3320 = vmatprep.subr.mxu0 %v2807_v2  ;;  %v3075_v41 = vld [vmem:[#allocation10 + $0x20] ss:$0 sm:$0xff] }
 0x782   :  { %3313 = vmatmul.mubr.msk.f32.vlgmr.msra.gmra.mxu0 %vm767_vm2, %v2171_v29 }
 0x783   :  { %3321 = vmatpush3.msra.mxu0 %v2807_v2 }
 0x784   :  { %3322 = vmatprep.subr.mxu0 %v2806_v5 }
 0x785   :  { %3323 = vmatpush3.msra.mxu0 %v2806_v5 }
 0x786   :  { %3324 = vmatprep.subr.mxu0 %v2805_v7 }
 0x787   :  { %3325 = vmatpush3.msra.mxu0 %v2805_v7 }
 0x788   :  { %3326 = vmatprep.subr.mxu0 %v2804_v8 }
 0x789   :  { %3327 = vmatpush3.msra.mxu0 %v2804_v8 }
 0x835   :  { %v2316_v30 = vpop.f32.mrf.mxu1 }
 0x836   :  { %v2243_v31 = vpop.f32.mrf.mxu0 }
 0x837   :  { %v3289_v33 = vpop.f32.mrf.mxu1 }
 0x838   :  { %v3284_v34 = vpop.f32.mrf.mxu0 }
 0x839   :  { %v2462_v60 = vpop.f32.mrf.mxu1 }
 0x83a   :  { %v2389_v35 = vpop.f32.mrf.mxu0  ;;  %v2759_v38 = vadd.f32 %v2462_v60, %v2316_v30 }
 0x83b   :  { %v3299_v36 = vpop.f32.mrf.mxu1  ;;  %v2758_v40 = vadd.f32 %v2389_v35, %v2243_v31 }
 0x83c   :  { %v3294_v46 = vpop.f32.mrf.mxu0 }
 0x83d   :  { %v2608_v37 = vpop.f32.mrf.mxu1 }
 0x83e   :  { %v2535_v39 = vpop.f32.mrf.mxu0  ;;  %v2761_v32 = vadd.f32 %v2759_v38, %v2608_v37 }
 0x83f   :  { %v3309_v42 = vpop.f32.mrf.mxu1  ;;  %v2760_v43 = vadd.f32 %v2758_v40, %v2535_v39 }
 0x840   :  { %v3304_v14 = vpop.f32.mrf.mxu0 }
 0x841   :  { %v2754_v44 = vpop.f32.mrf.mxu1 }
 0x842   :  { %v2681_v49 = vpop.f32.mrf.mxu0  ;;  %v2763_v47 = vadd.f32 %v2761_v32, %v2754_v44 }
 0x843   :  { %v2762_v45 = vadd.f32 %v2760_v43, %v2681_v49  ;;  %v3319_v48 = vpop.f32.mrf.mxu1 }
 0x844   :  { %v3919_v55 = vadd.f32 %v2763_v47, %v3787_v15  ;;  %v3314_v50 = vpop.f32.mrf.mxu0 }
 0x845   :  { %v3922_v52 = vadd.f32 %v2762_v45, %v3790_v17 }
 0x846   :  { %v2769_v56 = vsel %vm111_vm0, %v3919_v55, 0.0 }
 0x847   :  { %2770 = vadd.xlane.f32.xlu1 %v2769_v56  ;;  %v2766_v54 = vsel %vm111_vm0, %v3922_v52, 0.0 }
 0x848   :  { %2767 = vadd.xlane.f32.xlu0 %v2766_v54 }
 0x8d0   :  { %v2771_v59 = vpop.xlane.xlu1 %2770 }
 0x8d1   :  { %v2773_v51 = vmul.f32 0.03125, %v2771_v59  ;;  %v2768_v61 = vpop.xlane.xlu0 %2767 }
 0x8d2   :  { %v2772_v62 = vmul.f32 0.03125, %v2768_v61 }
 0x8d3   :  { %v2775_v63 = vsub.f32 %v3919_v55, %v2773_v51 }
 0x8d4   :  { %v2774_v15 = vsub.f32 %v3922_v52, %v2772_v62 }
 0x8d5   :  { %v2777_v57 = vmul.f32 %v2775_v63, %v2775_v63 }
 0x8d6   :  { %v2776_v3 = vmul.f32 %v2774_v15, %v2774_v15 }
 0x8d7   :  { %v2781_v17 = vsel %vm111_vm0, %v2777_v57, 0.0 }
 0x8d8   :  { %2782 = vadd.xlane.f32.xlu1 %v2781_v17  ;;  %v2778_v4 = vsel %vm111_vm0, %v2776_v3, 0.0 }
 0x8d9   :  { %2779 = vadd.xlane.f32.xlu0 %v2778_v4 }
 0x8e9   :  { %2904 = vrot.lane.b32.xlu1 %v2806_v5, %s3567_s2 }
 0x8ed   :  { %2902 = vrot.lane.b32.xlu1 %v2805_v7, %s3567_s2 }
 0x8ef   :  { %2906 = vrot.lane.b32.xlu0 %v2807_v2, %s3567_s2 }
 0x8f1   :  { %2900 = vrot.lane.b32.xlu1 %v2804_v8, %s3567_s2 }
 0x8f3   :  { %3001 = vrot.lane.b32.xlu0 %v3075_v41, %s3567_s2 }
 0x961   :  { %v2783_v6 = vpop.xlane.xlu1 %2782 }
 0x962   :  { %v2785_v9 = vmul.f32 0.03125, %v2783_v6  ;;  %v2780_v10 = vpop.xlane.xlu0 %2779 }
 0x963   :  { %v2784_v11 = vmul.f32 0.03125, %v2780_v10 }
 0x964   :  { %v2787_v12 = vadd.f32 1e-05, %v2785_v9 }
 0x965   :  { %v2786_v13 = vadd.f32 1e-05, %v2784_v11  ;;  %v2905_v19 = vpop.permute.xlu1 %2904 }
 0x966   :  { %3425 = vrsqrt.f32 %v2787_v12  ;;  %v2907_v18 = vpop.permute.xlu0 %2906 }
 0x967   :  { %3427 = vrsqrt.f32 %v2786_v13  ;;  %3331 = vmatprep.subr.msk.mxu1 %vm2908_vm3, %v2907_v18 }
 0x968   :  { %3332 = vmatpush3.xpose.msk.msra.mxu1 %vm2908_vm3, %v2907_v18 }
 0x969   :  { %3333 = vmatprep.subr.msk.mxu1 %vm2908_vm3, %v2905_v19  ;;  %v2903_v26 = vpop.permute.xlu1 %2902 }
 0x96a   :  { %v3002_v46 = vpop.permute.xlu0 %3001 }
 0x96c   :  { %3334 = vmatpush3.xpose.msk.msra.mxu1 %vm2908_vm3, %v2905_v19 }
 0x96d   :  { %3335 = vmatprep.subr.msk.mxu1 %vm2908_vm3, %v2903_v26  ;;  %v2901_v29 = vpop.permute.xlu1 %2900 }
 0x970   :  { %3336 = vmatpush3.xpose.msk.msra.mxu1 %vm2908_vm3, %v2903_v26 }
 0x971   :  { %3337 = vmatprep.subr.msk.mxu1 %vm2908_vm3, %v2901_v29 }
 0x973   :  { %v3426_v25 = vpop.eup %3425 }
 0x974   :  { %v3428_v1 = vpop.eup %3427  ;;  %v2791_v27 = vmul.f32 %v3426_v25, %v2775_v63  ;;  %3338 = vmatpush3.xpose.msk.msra.mxu1 %vm2908_vm3, %v2901_v29 }
 0x975   :  { %v2790_v58 = vmul.f32 %v3428_v1, %v2774_v15 }
 0x976   :  { %v2797_v28 = vmul.f32 %v2795_v23, %v2791_v27 }
 0x977   :  { %v2796_v22 = vmul.f32 %v2795_v23, %v2790_v58 }
 0x978   :  { %v2803_v0 = vadd.f32 %v2801_v53, %v2797_v28 }
 0x979   :  { %v2802_v24 = vadd.f32 %v2801_v53, %v2796_v22 }
 0x97b   :  { %3328 = vmatprep.mubr.msk.f32.mxu0 %vm111_vm0, %v2802_v24 }
 0x97c   :  { %3329 = vmatmul.mubr.msk.f32.vlgmr.msra.gmra.mxu0 %vm111_vm0, %v2803_v0 }
 0xa3c   :  { %v3330_v30 = vpop.f32.mrf.mxu0 }
 0xa3d   :  { %v2891_v31 = vadd.f32 %v3330_v30, %v3075_v41 }
 0xa3e   :  { %v2885_v33 = vpop.f32.mrf.mxu0 }
 0xa3f   :  { %v2886_v34 = vadd.f32 %v3075_v41, %v2885_v33  ;;  %v2895_v35 = vmax.f32 %v2891_v31, 0.0 }
 0xa41   :  { %v2894_v60 = vmax.f32 %v2886_v34, 0.0 }
 0xa43   :  { %3339 = vmatprep.mubr.msk.f32.mxu1 %vm2908_vm3, %v2894_v60 }
 0xa44   :  { %3340 = vmatmul.mubr.msk.f32.vlgmr.msra.gmra.mxu1 %vm2908_vm3, %v2895_v35 }
 0xb04   :  { %v3341_v36 = vpop.f32.mrf.mxu1 }
 0xb05   :  { %v2999_v37 = vadd.f32 %v3341_v36, %v3919_v55 }
 0xb06   :  { %v2989_v38 = vpop.f32.mrf.mxu1 }
 0xb07   :  { %v3005_v39 = vadd.f32 %v3002_v46, %v2999_v37  ;;  %v2998_v40 = vadd.f32 %v2989_v38, %v3922_v52 }
 0xb09   :  { %3007 = vst.msk [vmem:[#allocation11 + $0x8] sm:$0xff] %vm111_vm0, %v3005_v39  ;;  %v3004_v42 = vadd.f32 %v3002_v46, %v2998_v40 }
 0xb0b   :  { %3006 = vst.msk [vmem:[#allocation11] sm:$0xff] %vm111_vm0, %v3004_v42 }
 0xb0c   :  { %3541 = shalt.err (!%p3538_p1)
}
 0xb0d   :  { %3019 = dma.vmem_to_hbm [thread:$0]  %s3014_s17, 256, %s3966_s5, [#allocation4], %s3560_s23, %s3560_s23, %s3561_s24  }
 0xb0e   :  { %3556 = dma.done.wait [#allocation4], 256  }
 0xb0f   :  { %3557 = vsyncadd [#allocation4], 4294967040 }
 0xb10   :  { %3023 = vsyncpa [#allocation3], 1 }
 0xb11   :  { %3024 = vsyncpa [#allocation6], 1 }
 0xb12   :  { %3025 = vsyncpa [#allocation9], 1 }
 0xb13   :  { %3026 = vsyncpa [#allocation4], 1 }

</bundles_post_ra>
